<compile_context>
chip_gen: v7x
topology: tpu7x:2x2x1
jax: 0.10.0
libtpu: 0.0.40
codegen_flags: <defaults>
</compile_context>

<pallas_src>
import functools

import jax
import jax.numpy as jnp
from jax.experimental import pallas as pl
from jax.experimental.pallas import tpu as pltpu


_SQRT_HALF = 0.7071067811865476
# Below this dim the two (D, D) bf16 weights are tiny (<2 MiB even double
# buffered); at/above it, single-buffer them to halve the resident weight
# footprint (matters on v7x's 64 MiB VMEM).
_WEIGHT_SINGLE_BUFFER_MIN_D = 1024


def _round_up(n, m):
    return -(-n // m) * m


# ------------------------------------------------------------------ math helpers
def _erf(x):
    """Abramowitz & Stegun 7.1.26 erf approximation, |error| <= 1.5e-7 (f32).

    exp() is the only transcendental (EUP slot).  jax.lax.erf is the drop-in
    replacement once a native Mosaic erf lowering is guaranteed; the explicit
    polynomial keeps lowering bullet-proof, and this kernel is HBM-bound at
    small D anyway.
    """
    a1 = jnp.float32(0.254829592)
    a2 = jnp.float32(-0.284496736)
    a3 = jnp.float32(1.421413741)
    a4 = jnp.float32(-1.453152027)
    a5 = jnp.float32(1.061405429)
    p = jnp.float32(0.3275911)
    ax = jnp.abs(x)
    t = 1.0 / (1.0 + p * ax)
    poly = t * (a1 + t * (a2 + t * (a3 + t * (a4 + t * a5))))
    y = 1.0 - poly * jnp.exp(-ax * ax)          # exp runs on the EUP slot
    return jnp.where(x < 0.0, -y, y)


def _gelu_exact(x):
    """Exact (erf-based) GELU, matching torch.nn.GELU's default."""
    return 0.5 * x * (1.0 + _erf(x * jnp.float32(_SQRT_HALF)))


# ------------------------------------------------------------------ fused kernel
def _residual_block_kernel(x_ref, w1_ref, b1_ref, g1_ref, be1_ref,
                           w2_ref, b2_ref, g2_ref, be2_ref, o_ref,
                           *, eps, inv_d):
    """One row-tile of: out = x + LN2(GELU(LN1(x @ W1 + b1)) @ W2 + b2)."""
    eps = jnp.float32(eps)
    inv_d = jnp.float32(inv_d)

    xb = x_ref[...]                      # load the tile exactly once
    x_f32 = xb.astype(jnp.float32)

    def layernorm(h, g_ref, b_ref):
        # Fused stats: center once and reuse for variance + normalization;
        # mean via precomputed 1/D multiply (no divides).
        mu = jnp.sum(h, axis=-1, keepdims=True) * inv_d
        hc = h - mu
        var = jnp.sum(hc * hc, axis=-1, keepdims=True) * inv_d
        return hc * jax.lax.rsqrt(var + eps) * g_ref[...] + b_ref[...]

    # Linear 1: bf16 operands on the MXU, f32 accumulation.
    h = jnp.dot(xb.astype(w1_ref.dtype), w1_ref[...],
                preferred_element_type=jnp.float32)
    h = h + b1_ref[...]
    h = layernorm(h, g1_ref, be1_ref)
    h = _gelu_exact(h)
    # TODO(synk): nn.Dropout(p=0.1) is identity in inference mode; training-mode
    # dropout would need pltpu.prng_seed + pltpu.stateful_bernoulli and a
    # 1/(1-p) rescale here.

    # Linear 2.
    h = jnp.dot(h.astype(w2_ref.dtype), w2_ref[...],
                preferred_element_type=jnp.float32)
    h = h + b2_ref[...]
    h = layernorm(h, g2_ref, be2_ref)

    # Residual add, one lane-dense store.
    o_ref[...] = (x_f32 + h).astype(o_ref.dtype)


# ------------------------------------------------------------------ tiling
def _pick_block_rows(m, d, x_itemsize, out_itemsize, w_itemsize,
                     *, target_rows=1024, vmem_budget=48 << 20):
    """Largest multiple-of-8 row tile <= target_rows that fits the VMEM budget.

    Per step we hold: x tile (double-buffered), out tile (double-buffered),
    both (D, D) weights, and ~4 f32 (bm, D) intermediates.  No divisibility or
    ">=2 grid steps" constraints: the wrapper pads M up to grid*bm.
    """
    m8 = _round_up(max(m, 1), 8)
    w_bufs = 1 if d >= _WEIGHT_SINGLE_BUFFER_MIN_D else 2
    weight_bytes = 2 * d * d * w_itemsize * w_bufs
    per_row = d * (2 * x_itemsize + 2 * out_itemsize + 4 * 4)
    avail = max(vmem_budget - weight_bytes, per_row * 8)
    bm = min(target_rows, avail // per_row, m8)
    return max(8, (int(bm) // 8) * 8)


# ------------------------------------------------------------------ wrapper
def residual_block(x, params, *, eps=1e-5):
    """x: (..., dim).  params: dict with (in, out)-layout weights (see init_params)."""
    orig_shape = x.shape
    D = orig_shape[-1]                   # lane-dense when a multiple of 128
    x2 = x.reshape(-1, D)
    M = x2.shape[0]

    out_dtype = x.dtype
    x_isz = jnp.dtype(x.dtype).itemsize
    o_isz = jnp.dtype(out_dtype).itemsize
    w_isz = jnp.dtype(params["w1"].dtype).itemsize

    bm = _pick_block_rows(M, D, x_isz, o_isz, w_isz)
    grid_m = pl.cdiv(M, bm)
    M_pad = grid_m * bm
    if M_pad != M:
        # Padded rows flow through the whole pipeline (finite: var=0 -> rsqrt(eps))
        # and are sliced off at the end.
        x2 = jnp.pad(x2, ((0, M_pad - M), (0, 0)))

    row_spec = pl.BlockSpec((bm, D), lambda i: (i, 0))

    def const_spec(shape):
        # Constant block index -> operand stays VMEM-resident across grid steps.
        if D >= _WEIGHT_SINGLE_BUFFER_MIN_D:
            # Double-buffering a never-changing block buys nothing; halve its VMEM.
            return pl.BlockSpec(shape, lambda i: (0, 0), pipeline_mode=pl.Buffered(1))
        return pl.BlockSpec(shape, lambda i: (0, 0))
    # TODO(synk): for D >= ~2048 on v7x (64 MiB VMEM) the fully-resident (D, D)
    # weights no longer fit; W1 needs an N-tile axis and W2 a K-tile axis with an
    # f32 VMEM accumulator (pl.when init/finalize).  Keep such tiles multiples of
    # 256 to fill the v6e/v7x MXU.

    # Per-channel params are pre-cast to f32 once on the host: the kernel has no
    # per-step up-cast/broadcast work for them (negligible extra HBM bytes).
    def vec32(p):
        return p.astype(jnp.float32).reshape(1, D)

    w_bufs = 1 if D >= _WEIGHT_SINGLE_BUFFER_MIN_D else 2
    vmem_need = (2 * D * D * w_isz * w_bufs
                 + bm * D * (2 * x_isz + 2 * o_isz + 4 * 4)
                 + 12 * D * 4
                 + (2 << 20))                                   # compiler scratch headroom
    vmem_limit = int(min(max(vmem_need, 32 << 20), 64 << 20))   # <= v7x physical VMEM

    cost = pl.CostEstimate(
        flops=4 * M_pad * D * D,                 # two (bm,D)x(D,D) matmuls per row tile
        transcendentals=2 * M_pad * D,           # exp in GELU (+ rsqrt in the LNs)
        bytes_accessed=M_pad * D * (x_isz + o_isz) + 2 * D * D * w_isz + 6 * D * 4,
    )

    out = pl.pallas_call(
        functools.partial(_residual_block_kernel, eps=eps, inv_d=1.0 / D),
        out_shape=jax.ShapeDtypeStruct((M_pad, D), out_dtype),
        grid=(grid_m,),
        in_specs=[
            row_spec,
            const_spec((D, D)), const_spec((1, D)), const_spec((1, D)), const_spec((1, D)),
            const_spec((D, D)), const_spec((1, D)), const_spec((1, D)), const_spec((1, D)),
        ],
        out_specs=row_spec,
        compiler_params=pltpu.CompilerParams(
            # Large row tiles mean small batches collapse to a single grid step,
            # so the megacore split only happens when each v7x TC has real work;
            # on v5e/v6e "parallel" is a harmless no-op.
            dimension_semantics=("parallel",),
            vmem_limit_bytes=vmem_limit,
        ),
        cost_estimate=cost,
    )(x2,
      params["w1"], vec32(params["b1"]), vec32(params["ln1_g"]), vec32(params["ln1_b"]),
      params["w2"], vec32(params["b2"]), vec32(params["ln2_g"]), vec32(params["ln2_b"]))

    return out[:M].reshape(orig_shape)


# ------------------------------------------------------------------ params
def init_params(key, dim, weight_dtype=jnp.bfloat16):
    """Weights in (in, out) layout (transposed vs. PyTorch Linear.weight).
    Per-channel params are stored f32 so the kernel never up-casts them."""
    k1, k2, k3, k4, k5, k6 = jax.random.split(key, 6)
    scale = 1.0 / (dim ** 0.5)
    return {
        "w1": (scale * jax.random.normal(k1, (dim, dim))).astype(weight_dtype),
        "b1": 0.02 * jax.random.normal(k3, (dim,), jnp.float32),
        "ln1_g": 1.0 + 0.05 * jax.random.normal(k5, (dim,), jnp.float32),
        "ln1_b": 0.02 * jax.random.normal(k6, (dim,), jnp.float32),
        "w2": (scale * jax.random.normal(k2, (dim, dim))).astype(weight_dtype),
        "b2": 0.02 * jax.random.normal(k4, (dim,), jnp.float32),
        "ln2_g": jnp.ones((dim,), jnp.float32),
        "ln2_b": jnp.zeros((dim,), jnp.float32),
    }


# ------------------------------------------------------------------ reference
def _reference(x, params, eps=1e-5):
    """Pure-JAX reference with the same bf16-operand / f32-accumulate matmuls."""
    xf = x.astype(jnp.float32)

    def ln(h, g, b):
        mu = jnp.mean(h, axis=-1, keepdims=True)
        var = jnp.mean((h - mu) ** 2, axis=-1, keepdims=True)
        return (h - mu) * jax.lax.rsqrt(var + eps) * g + b

    w1, w2 = params["w1"], params["w2"]
    h = jnp.dot(x.astype(w1.dtype), w1, preferred_element_type=jnp.float32) + params["b1"]
    h = ln(h, params["ln1_g"], params["ln1_b"])
    h = jax.nn.gelu(h, approximate=False)
    h = jnp.dot(h.astype(w2.dtype), w2, preferred_element_type=jnp.float32) + params["b2"]
    h = ln(h, params["ln2_g"], params["ln2_b"])
    return (xf + h).astype(x.dtype)


# ------------------------------------------------------------------ main
if __name__ == "__main__":
    B, S, D = 2, 8, 128          # lane-dense dim=128; 16 rows -> one (16, 128) tile
    key = jax.random.PRNGKey(0)
    kx, kp = jax.random.split(key)

    x = jax.random.normal(kx, (B, S, D), dtype=jnp.float32)
    params = init_params(kp, D)              # bf16 weight storage, f32 accumulation

    out = jax.block_until_ready(residual_block(x, params))
    ref = jax.block_until_ready(_reference(x, params))

    assert out.shape == (B, S, D) and out.dtype == x.dtype
    assert bool(jnp.all(jnp.isfinite(out)))
    max_err = float(jnp.max(jnp.abs(out.astype(jnp.float32) - ref.astype(jnp.float32))))
    assert max_err < 5e-2, f"max abs error vs reference: {max_err}"
    print("KERNEL_OK")
</pallas_src>

<mosaic_0001>
module attributes {stable_mosaic.version = 11 : i64} {
  func.func @_residual_block_kernel(%arg0: i32, %arg1: memref<16x128xf32, #tpu.memory_space<vmem>>, %arg2: memref<128x128xbf16, #tpu.memory_space<vmem>>, %arg3: memref<1x128xf32, #tpu.memory_space<vmem>>, %arg4: memref<1x128xf32, #tpu.memory_space<vmem>>, %arg5: memref<1x128xf32, #tpu.memory_space<vmem>>, %arg6: memref<128x128xbf16, #tpu.memory_space<vmem>>, %arg7: memref<1x128xf32, #tpu.memory_space<vmem>>, %arg8: memref<1x128xf32, #tpu.memory_space<vmem>>, %arg9: memref<1x128xf32, #tpu.memory_space<vmem>>, %arg10: memref<16x128xf32, #tpu.memory_space<vmem>>) attributes {dimension_semantics = [#tpu.dimension_semantics<parallel>], iteration_bounds = array<i64: 1>, scalar_prefetch = 0 : i64, scratch_operands = 0 : i64, tpu.core_type = #tpu.core_type<tc>, window_params = [{transform_indices = @transform_0, window_bounds = array<i64: 16, 128>}, {pipeline_mode = #tpu.pipeline_mode<synchronous>, transform_indices = @transform_1, window_bounds = array<i64: 128, 128>}, {pipeline_mode = #tpu.pipeline_mode<synchronous>, transform_indices = @transform_2, window_bounds = array<i64: 1, 128>}, {pipeline_mode = #tpu.pipeline_mode<synchronous>, transform_indices = @transform_3, window_bounds = array<i64: 1, 128>}, {pipeline_mode = #tpu.pipeline_mode<synchronous>, transform_indices = @transform_4, window_bounds = array<i64: 1, 128>}, {pipeline_mode = #tpu.pipeline_mode<synchronous>, transform_indices = @transform_5, window_bounds = array<i64: 128, 128>}, {pipeline_mode = #tpu.pipeline_mode<synchronous>, transform_indices = @transform_6, window_bounds = array<i64: 1, 128>}, {pipeline_mode = #tpu.pipeline_mode<synchronous>, transform_indices = @transform_7, window_bounds = array<i64: 1, 128>}, {pipeline_mode = #tpu.pipeline_mode<synchronous>, transform_indices = @transform_8, window_bounds = array<i64: 1, 128>}, {transform_indices = @transform_9, window_bounds = array<i64: 16, 128>}]} {
    %c0 = arith.constant 0 : index
    %c0_0 = arith.constant 0 : index
    %0 = vector.load %arg1[%c0, %c0_0] : memref<16x128xf32, #tpu.memory_space<vmem>>, vector<16x128xf32>
    %1 = arith.truncf %0 : vector<16x128xf32> to vector<16x128xbf16>
    %c0_1 = arith.constant 0 : index
    %c0_2 = arith.constant 0 : index
    %2 = vector.load %arg2[%c0_1, %c0_2] : memref<128x128xbf16, #tpu.memory_space<vmem>>, vector<128x128xbf16>
    %cst = arith.constant dense<0.000000e+00> : vector<16x128xf32>
    %3 = tpu.matmul %1, %2, %cst {dimension_numbers = #tpu.dot_dimension_numbers<[1], [0], [0], [1], [0, 0, 1, 1], [], []>} : vector<16x128xbf16>, vector<128x128xbf16>, vector<16x128xf32> -> vector<16x128xf32>
    %c0_3 = arith.constant 0 : index
    %c0_4 = arith.constant 0 : index
    %4 = vector.load %arg3[%c0_3, %c0_4] : memref<1x128xf32, #tpu.memory_space<vmem>>, vector<1x128xf32>
    %5 = vector.broadcast %4 : vector<1x128xf32> to vector<16x128xf32>
    %6 = arith.addf %3, %5 : vector<16x128xf32>
    %cst_5 = arith.constant dense<0.000000e+00> : vector<16xf32>
    %7 = vector.multi_reduction <add>, %6, %cst_5 [1] : vector<16x128xf32> to vector<16xf32>
    %8 = vector.shape_cast %7 : vector<16xf32> to vector<16x1xf32>
    %cst_6 = arith.constant 7.812500e-03 : f32
    %9 = vector.broadcast %cst_6 : f32 to vector<16x1xf32>
    %10 = arith.mulf %8, %9 : vector<16x1xf32>
    %11 = vector.broadcast %10 : vector<16x1xf32> to vector<16x128xf32>
    %12 = arith.subf %6, %11 : vector<16x128xf32>
    %13 = arith.mulf %12, %12 : vector<16x128xf32>
    %cst_7 = arith.constant dense<0.000000e+00> : vector<16xf32>
    %14 = vector.multi_reduction <add>, %13, %cst_7 [1] : vector<16x128xf32> to vector<16xf32>
    %15 = vector.shape_cast %14 : vector<16xf32> to vector<16x1xf32>
    %cst_8 = arith.constant 7.812500e-03 : f32
    %16 = vector.broadcast %cst_8 : f32 to vector<16x1xf32>
    %17 = arith.mulf %15, %16 : vector<16x1xf32>
    %cst_9 = arith.constant 9.99999974E-6 : f32
    %18 = vector.broadcast %cst_9 : f32 to vector<16x1xf32>
    %19 = arith.addf %17, %18 : vector<16x1xf32>
    %20 = math.rsqrt %19 : vector<16x1xf32>
    %21 = vector.broadcast %20 : vector<16x1xf32> to vector<16x128xf32>
    %22 = arith.mulf %12, %21 : vector<16x128xf32>
    %c0_10 = arith.constant 0 : index
    %c0_11 = arith.constant 0 : index
    %23 = vector.load %arg4[%c0_10, %c0_11] : memref<1x128xf32, #tpu.memory_space<vmem>>, vector<1x128xf32>
    %24 = vector.broadcast %23 : vector<1x128xf32> to vector<16x128xf32>
    %25 = arith.mulf %22, %24 : vector<16x128xf32>
    %c0_12 = arith.constant 0 : index
    %c0_13 = arith.constant 0 : index
    %26 = vector.load %arg5[%c0_12, %c0_13] : memref<1x128xf32, #tpu.memory_space<vmem>>, vector<1x128xf32>
    %27 = vector.broadcast %26 : vector<1x128xf32> to vector<16x128xf32>
    %28 = arith.addf %25, %27 : vector<16x128xf32>
    %cst_14 = arith.constant 5.000000e-01 : f32
    %29 = vector.broadcast %cst_14 : f32 to vector<16x128xf32>
    %30 = arith.mulf %29, %28 : vector<16x128xf32>
    %cst_15 = arith.constant 0.707106769 : f32
    %31 = vector.broadcast %cst_15 : f32 to vector<16x128xf32>
    %32 = arith.mulf %28, %31 : vector<16x128xf32>
    %33 = math.absf %32 : vector<16x128xf32>
    %cst_16 = arith.constant 0.327591091 : f32
    %34 = vector.broadcast %cst_16 : f32 to vector<16x128xf32>
    %35 = arith.mulf %34, %33 : vector<16x128xf32>
    %cst_17 = arith.constant 1.000000e+00 : f32
    %36 = vector.broadcast %cst_17 : f32 to vector<16x128xf32>
    %37 = arith.addf %36, %35 : vector<16x128xf32>
    %cst_18 = arith.constant 1.000000e+00 : f32
    %38 = vector.broadcast %cst_18 : f32 to vector<16x128xf32>
    %39 = arith.divf %38, %37 : vector<16x128xf32>
    %cst_19 = arith.constant 1.06140542 : f32
    %40 = vector.broadcast %cst_19 : f32 to vector<16x128xf32>
    %41 = arith.mulf %39, %40 : vector<16x128xf32>
    %cst_20 = arith.constant -1.45315206 : f32
    %42 = vector.broadcast %cst_20 : f32 to vector<16x128xf32>
    %43 = arith.addf %42, %41 : vector<16x128xf32>
    %44 = arith.mulf %39, %43 : vector<16x128xf32>
    %cst_21 = arith.constant 1.42141378 : f32
    %45 = vector.broadcast %cst_21 : f32 to vector<16x128xf32>
    %46 = arith.addf %45, %44 : vector<16x128xf32>
    %47 = arith.mulf %39, %46 : vector<16x128xf32>
    %cst_22 = arith.constant -0.284496725 : f32
    %48 = vector.broadcast %cst_22 : f32 to vector<16x128xf32>
    %49 = arith.addf %48, %47 : vector<16x128xf32>
    %50 = arith.mulf %39, %49 : vector<16x128xf32>
    %cst_23 = arith.constant 0.254829586 : f32
    %51 = vector.broadcast %cst_23 : f32 to vector<16x128xf32>
    %52 = arith.addf %51, %50 : vector<16x128xf32>
    %53 = arith.mulf %39, %52 : vector<16x128xf32>
    %cst_24 = arith.constant 0.000000e+00 : f32
    %54 = vector.broadcast %cst_24 : f32 to vector<16x128xf32>
    %55 = arith.subf %54, %33 : vector<16x128xf32>
    %56 = arith.mulf %55, %33 : vector<16x128xf32>
    %57 = math.exp %56 : vector<16x128xf32>
    %58 = arith.mulf %53, %57 : vector<16x128xf32>
    %cst_25 = arith.constant 1.000000e+00 : f32
    %59 = vector.broadcast %cst_25 : f32 to vector<16x128xf32>
    %60 = arith.subf %59, %58 : vector<16x128xf32>
    %cst_26 = arith.constant 0.000000e+00 : f32
    %61 = vector.broadcast %cst_26 : f32 to vector<16x128xf32>
    %62 = arith.cmpf olt, %32, %61 : vector<16x128xf32>
    %cst_27 = arith.constant 0.000000e+00 : f32
    %63 = vector.broadcast %cst_27 : f32 to vector<16x128xf32>
    %64 = arith.subf %63, %60 : vector<16x128xf32>
    %65 = arith.select %62, %64, %60 : vector<16x128xi1>, vector<16x128xf32>
    %cst_28 = arith.constant 1.000000e+00 : f32
    %66 = vector.broadcast %cst_28 : f32 to vector<16x128xf32>
    %67 = arith.addf %66, %65 : vector<16x128xf32>
    %68 = arith.mulf %30, %67 : vector<16x128xf32>
    %69 = arith.truncf %68 : vector<16x128xf32> to vector<16x128xbf16>
    %c0_29 = arith.constant 0 : index
    %c0_30 = arith.constant 0 : index
    %70 = vector.load %arg6[%c0_29, %c0_30] : memref<128x128xbf16, #tpu.memory_space<vmem>>, vector<128x128xbf16>
    %cst_31 = arith.constant dense<0.000000e+00> : vector<16x128xf32>
    %71 = tpu.matmul %69, %70, %cst_31 {dimension_numbers = #tpu.dot_dimension_numbers<[1], [0], [0], [1], [0, 0, 1, 1], [], []>} : vector<16x128xbf16>, vector<128x128xbf16>, vector<16x128xf32> -> vector<16x128xf32>
    %c0_32 = arith.constant 0 : index
    %c0_33 = arith.constant 0 : index
    %72 = vector.load %arg7[%c0_32, %c0_33] : memref<1x128xf32, #tpu.memory_space<vmem>>, vector<1x128xf32>
    %73 = vector.broadcast %72 : vector<1x128xf32> to vector<16x128xf32>
    %74 = arith.addf %71, %73 : vector<16x128xf32>
    %cst_34 = arith.constant dense<0.000000e+00> : vector<16xf32>
    %75 = vector.multi_reduction <add>, %74, %cst_34 [1] : vector<16x128xf32> to vector<16xf32>
    %76 = vector.shape_cast %75 : vector<16xf32> to vector<16x1xf32>
    %cst_35 = arith.constant 7.812500e-03 : f32
    %77 = vector.broadcast %cst_35 : f32 to vector<16x1xf32>
    %78 = arith.mulf %76, %77 : vector<16x1xf32>
    %79 = vector.broadcast %78 : vector<16x1xf32> to vector<16x128xf32>
    %80 = arith.subf %74, %79 : vector<16x128xf32>
    %81 = arith.mulf %80, %80 : vector<16x128xf32>
    %cst_36 = arith.constant dense<0.000000e+00> : vector<16xf32>
    %82 = vector.multi_reduction <add>, %81, %cst_36 [1] : vector<16x128xf32> to vector<16xf32>
    %83 = vector.shape_cast %82 : vector<16xf32> to vector<16x1xf32>
    %cst_37 = arith.constant 7.812500e-03 : f32
    %84 = vector.broadcast %cst_37 : f32 to vector<16x1xf32>
    %85 = arith.mulf %83, %84 : vector<16x1xf32>
    %cst_38 = arith.constant 9.99999974E-6 : f32
    %86 = vector.broadcast %cst_38 : f32 to vector<16x1xf32>
    %87 = arith.addf %85, %86 : vector<16x1xf32>
    %88 = math.rsqrt %87 : vector<16x1xf32>
    %89 = vector.broadcast %88 : vector<16x1xf32> to vector<16x128xf32>
    %90 = arith.mulf %80, %89 : vector<16x128xf32>
    %c0_39 = arith.constant 0 : index
    %c0_40 = arith.constant 0 : index
    %91 = vector.load %arg8[%c0_39, %c0_40] : memref<1x128xf32, #tpu.memory_space<vmem>>, vector<1x128xf32>
    %92 = vector.broadcast %91 : vector<1x128xf32> to vector<16x128xf32>
    %93 = arith.mulf %90, %92 : vector<16x128xf32>
    %c0_41 = arith.constant 0 : index
    %c0_42 = arith.constant 0 : index
    %94 = vector.load %arg9[%c0_41, %c0_42] : memref<1x128xf32, #tpu.memory_space<vmem>>, vector<1x128xf32>
    %95 = vector.broadcast %94 : vector<1x128xf32> to vector<16x128xf32>
    %96 = arith.addf %93, %95 : vector<16x128xf32>
    %97 = arith.addf %0, %96 : vector<16x128xf32>
    %c0_43 = arith.constant 0 : index
    %c0_44 = arith.constant 0 : index
    %98 = vector.load %arg10[%c0_43, %c0_44] : memref<16x128xf32, #tpu.memory_space<vmem>>, vector<16x128xf32>
    tpu.vector_store %arg10[%c0_43, %c0_44], %97 {strides = array<i32>} : memref<16x128xf32, #tpu.memory_space<vmem>>, vector<16x128xf32>,
    return
  }
  func.func @transform_0(%arg0: i32) -> (i32, i32) {
    %c0_i32 = arith.constant 0 : i32
    %c0_i32_0 = arith.constant 0 : i32
    return %arg0, %c0_i32 : i32, i32
  }
  func.func @transform_1(%arg0: i32) -> (i32, i32) {
    %c0_i32 = arith.constant 0 : i32
    %c0_i32_0 = arith.constant 0 : i32
    %c0_i32_1 = arith.constant 0 : i32
    return %c0_i32, %c0_i32_0 : i32, i32
  }
  func.func @transform_2(%arg0: i32) -> (i32, i32) {
    %c0_i32 = arith.constant 0 : i32
    %c0_i32_0 = arith.constant 0 : i32
    %c0_i32_1 = arith.constant 0 : i32
    return %c0_i32, %c0_i32_0 : i32, i32
  }
  func.func @transform_3(%arg0: i32) -> (i32, i32) {
    %c0_i32 = arith.constant 0 : i32
    %c0_i32_0 = arith.constant 0 : i32
    %c0_i32_1 = arith.constant 0 : i32
    return %c0_i32, %c0_i32_0 : i32, i32
  }
  func.func @transform_4(%arg0: i32) -> (i32, i32) {
    %c0_i32 = arith.constant 0 : i32
    %c0_i32_0 = arith.constant 0 : i32
    %c0_i32_1 = arith.constant 0 : i32
    return %c0_i32, %c0_i32_0 : i32, i32
  }
  func.func @transform_5(%arg0: i32) -> (i32, i32) {
    %c0_i32 = arith.constant 0 : i32
    %c0_i32_0 = arith.constant 0 : i32
    %c0_i32_1 = arith.constant 0 : i32
    return %c0_i32, %c0_i32_0 : i32, i32
  }
  func.func @transform_6(%arg0: i32) -> (i32, i32) {
    %c0_i32 = arith.constant 0 : i32
    %c0_i32_0 = arith.constant 0 : i32
    %c0_i32_1 = arith.constant 0 : i32
    return %c0_i32, %c0_i32_0 : i32, i32
  }
  func.func @transform_7(%arg0: i32) -> (i32, i32) {
    %c0_i32 = arith.constant 0 : i32
    %c0_i32_0 = arith.constant 0 : i32
    %c0_i32_1 = arith.constant 0 : i32
    return %c0_i32, %c0_i32_0 : i32, i32
  }
  func.func @transform_8(%arg0: i32) -> (i32, i32) {
    %c0_i32 = arith.constant 0 : i32
    %c0_i32_0 = arith.constant 0 : i32
    %c0_i32_1 = arith.constant 0 : i32
    return %c0_i32, %c0_i32_0 : i32, i32
  }
  func.func @transform_9(%arg0: i32) -> (i32, i32) {
    %c0_i32 = arith.constant 0 : i32
    %c0_i32_0 = arith.constant 0 : i32
    return %arg0, %c0_i32 : i32, i32
  }
}

</mosaic_0001>

<bundles_post_ra>
// kernel: tpu_custom_call.1
= control target key start
LH: loop header
LB: loop body
LE: loop exit
PB: predicated region body
PF: predicated region fallthrough
CT: control target
= control target key end

     0   :  { %14 = vsyncpa [#allocation3], 0  ;;  %s839_s0 = inlined_call_operand.hbm [shape: f32[16,128], index: 0, kind: input, shape index: {}]   ;;  %s840_s1 = inlined_call_operand.hbm [shape: bf16[128,128], index: 1, kind: input, shape index: {}]   ;;  %s841_s2 = inlined_call_operand.vmem [shape: f32[1,128], index: 2, kind: input, shape index: {}]   ;;  %s842_s3 = inlined_call_operand.vmem [shape: f32[1,128], index: 3, kind: input, shape index: {}]   ;;  %s843_s4 = inlined_call_operand.vmem [shape: f32[1,128], index: 4, kind: input, shape index: {}]   ;;  %s844_s5 = inlined_call_operand.hbm [shape: bf16[128,128], index: 5, kind: input, shape index: {}]   ;;  %s845_s6 = inlined_call_operand.vmem [shape: f32[1,128], index: 6, kind: input, shape index: {}]   ;;  %s846_s7 = inlined_call_operand.vmem [shape: f32[1,128], index: 7, kind: input, shape index: {}]   ;;  %s847_s8 = inlined_call_operand.vmem [shape: f32[1,128], index: 8, kind: input, shape index: {}]   ;;  %s848_s9 = inlined_call_operand.hbm [shape: f32[16,128], index: 9, kind: output, shape index: {}]  }
   0x1   :  { %15 = vsyncpa [#allocation6], 0 }
   0x2   :  { %16 = vsyncpa [#allocation4], 0  ;;  %s675_s30 = smov [#allocation5]   ;;  %s581_s13 = scalar_lea.hbm %s840_s1, 1024 }
   0x3   :  { %s34_s10 = sshll.u32 %s675_s30, 4  ;;  %p582_p0 = scmp.ne.s32.totalorder %s840_s1, %s581_s13  ;;  %s35_s10 = int_to_ptr.vmem [resolvable:$true] %s34_s10 }
   0x4   :  { %p585_p1 = scmp.lt.u32.totalorder %s581_s13, %s840_s1 }
   0x6   :  { %p587_p2 = pnand %p585_p1, %p582_p0 }
   0x8   :  { %590 = shalt.err (!%p587_p2)
}
   0x9   :  { %s591_s18 = scalar_lea.vmem %s35_s10, 1024  ;;  %p596_p4 = scmp.lt.s32.totalorder %s35_s10, %s35_s10 }
   0xa   :  { %p592_p3 = scmp.ne.s32.totalorder %s35_s10, %s591_s18  ;;  %p597_p5 = scmp.lt.s32.totalorder %s591_s18, %s591_s18 }
   0xc   :  { %p598_p6 = por %p597_p5, %p596_p4 }
   0xe   :  { %p599_p7 = pnand %p598_p6, %p592_p3 }
  0x10   :  { %602 = shalt.err (!%p599_p7)
}
  0x11   :  { %s676_s19 = smov 64   ;;  %s677_s20 = smov 4  }
  0x12   :  { %40 = dma.hbm_to_vmem [thread:$0]  %s840_s1, 1024, %s35_s10, [#allocation6], %s676_s19, %s676_s19, %s677_s20  }
  0x13   :  { %s678_s23 = smov [#allocation2]   ;;  %s603_s27 = scalar_lea.hbm %s839_s0, 256 }
  0x14   :  { %s22_s24 = sshll.u32 %s678_s23, 4  ;;  %p604_p8 = scmp.ne.s32.totalorder %s839_s0, %s603_s27  ;;  %s23_s24 = int_to_ptr.vmem [resolvable:$true] %s22_s24 }
  0x15   :  { %p607_p9 = scmp.lt.u32.totalorder %s603_s27, %s839_s0 }
  0x17   :  { %p609_p10 = pnand %p607_p9, %p604_p8 }
  0x19   :  { %612 = shalt.err (!%p609_p10)
}
  0x1a   :  { %s613_s12 = scalar_lea.vmem %s23_s24, 256  ;;  %p618_p12 = scmp.lt.s32.totalorder %s23_s24, %s23_s24 }
  0x1b   :  { %p614_p11 = scmp.ne.s32.totalorder %s23_s24, %s613_s12  ;;  %p619_p13 = scmp.lt.s32.totalorder %s613_s12, %s613_s12 }
  0x1d   :  { %p620_p0 = por %p619_p13, %p618_p12 }
  0x1f   :  { %p621_p1 = pnand %p620_p0, %p614_p11 }
  0x21   :  { %624 = shalt.err (!%p621_p1)
}
  0x22   :  { %s679_s1 = smov 128   ;;  %s680_s10 = smov 8  }
  0x23   :  { %28 = dma.hbm_to_vmem [thread:$0]  %s839_s0, 256, %s23_s24, [#allocation3], %s679_s1, %s679_s1, %s680_s10  }
  0x24   :  { %s681_s15 = smov [#allocation7]   ;;  %s625_s21 = scalar_lea.hbm %s844_s5, 1024 }
  0x25   :  { %s52_s16 = sshll.u32 %s681_s15, 4  ;;  %p626_p2 = scmp.ne.s32.totalorder %s844_s5, %s625_s21  ;;  %s53_s16 = int_to_ptr.vmem [resolvable:$true] %s52_s16 }
  0x26   :  { %p629_p3 = scmp.lt.u32.totalorder %s625_s21, %s844_s5 }
  0x28   :  { %p631_p4 = pnand %p629_p3, %p626_p2 }
  0x2a   :  { %634 = shalt.err (!%p631_p4)
}
  0x2b   :  { %s635_s27 = scalar_lea.vmem %s53_s16, 1024  ;;  %p640_p6 = scmp.lt.s32.totalorder %s53_s16, %s53_s16 }
  0x2c   :  { %p636_p5 = scmp.ne.s32.totalorder %s53_s16, %s635_s27  ;;  %p641_p7 = scmp.lt.s32.totalorder %s635_s27, %s635_s27 }
  0x2e   :  { %p642_p8 = por %p641_p7, %p640_p6 }
  0x30   :  { %p643_p9 = pnand %p642_p8, %p636_p5 }
  0x32   :  { %646 = shalt.err (!%p643_p9)
}
  0x33   :  { %58 = dma.hbm_to_vmem [thread:$0]  %s844_s5, 1024, %s53_s16, [#allocation6], %s676_s19, %s676_s19, %s677_s20  }
  0x34   :  { %669 = dma.done.wait [#allocation3], 256  }
  0x35   :  { %670 = vsyncadd [#allocation3], 4294967040 }
  0x36   :  { %671 = dma.done.wait [#allocation6], 2048  }
  0x37   :  { %672 = vsyncadd [#allocation6], 4294965248  ;;  %v682_v0 = vmov 0.0   ;;  %vm683_vm0 = vmmov 0   ;;  %v549_v1 = vld [vmem:[#allocation5] sm:$0xff]   ;;  %v550_v2 = vld [vmem:[#allocation5 + $0x8] sm:$0xff]  }
  0x38   :  { %499 = vmatprep.subr.bf16.mxu0 %v682_v0  ;;  %515 = vmatprep.mubr.msk.bf16.mxu0 %vm683_vm0, %v682_v0  ;;  %v551_v3 = vld [vmem:[#allocation5 + $0x10] sm:$0xff]   ;;  %v552_v4 = vld [vmem:[#allocation5 + $0x18] sm:$0xff]   ;;  %v553_v5 = vld [vmem:[#allocation5 + $0x20] sm:$0xff]   ;;  %s684_s13 = smov [#allocation8]  }
  0x39   :  { %519 = vmatprep.subr.bf16.mxu1 %v682_v0  ;;  %535 = vmatprep.mubr.msk.bf16.mxu1 %vm683_vm0, %v682_v0  ;;  %v554_v6 = vld [vmem:[#allocation5 + $0x28] sm:$0xff]   ;;  %v555_v7 = vld [vmem:[#allocation5 + $0x30] sm:$0xff]   ;;  %v556_v8 = vld [vmem:[#allocation5 + $0x38] sm:$0xff]   ;;  %s446_s14 = sshll.u32 %s684_s13, 4  ;;  %s447_s14 = int_to_ptr.vmem [resolvable:$true] %s446_s14 }
  0x3a   :  { %500 = vmatpush3.bf16.msra.mxu0 %v549_v1  ;;  %v790_v9 = vld [vmem:[#allocation2] sm:$0xff]  ;;  %v792_v10 = vld [vmem:[#allocation2 + $0x8] sm:$0xff]  ;;  %v557_v27 = vld [vmem:[#allocation7] sm:$0xff]   ;;  %p652_p11 = scmp.lt.s32.totalorder %s447_s14, %s447_s14 }
  0x3b   :  { %501 = vmatprep.subr.bf16.mxu0 %v682_v0  ;;  %v77_v11 = vpack.c.bf16 %v792_v10, %v790_v9  ;;  %v459_v12 = vld [vmem:[%s841_s2] ss:$0 sm:$0xff]  ;;  %520 = vmatpush3.bf16.msra.mxu1 %v557_v27  ;;  %v558_v28 = vld [vmem:[#allocation7 + $0x8] sm:$0xff]   ;;  %v560_v30 = vld [vmem:[#allocation7 + $0x18] sm:$0xff]  }
  0x3c   :  { %521 = vmatprep.subr.bf16.mxu1 %v682_v0  ;;  %v559_v29 = vld [vmem:[#allocation7 + $0x10] sm:$0xff]   ;;  %v561_v31 = vld [vmem:[#allocation7 + $0x20] sm:$0xff]   ;;  %v562_v32 = vld [vmem:[#allocation7 + $0x28] sm:$0xff]  }
  0x3d   :  { %v563_v33 = vld [vmem:[#allocation7 + $0x30] sm:$0xff]   ;;  %v564_v34 = vld [vmem:[#allocation7 + $0x38] sm:$0xff]  }
  0x3e   :  { %502 = vmatpush3.bf16.msra.mxu0 %v550_v2  ;;  %v468_v42 = vld [vmem:[%s842_s3] ss:$0 sm:$0xff] }
  0x3f   :  { %503 = vmatprep.subr.bf16.mxu0 %v682_v0  ;;  %522 = vmatpush3.bf16.msra.mxu1 %v558_v28  ;;  %v469_v44 = vld [vmem:[%s843_s4] ss:$0 sm:$0xff] }
  0x40   :  { %523 = vmatprep.subr.bf16.mxu1 %v682_v0 }
  0x42   :  { %504 = vmatpush3.bf16.msra.mxu0 %v551_v3 }
  0x43   :  { %505 = vmatprep.subr.bf16.mxu0 %v682_v0  ;;  %524 = vmatpush3.bf16.msra.mxu1 %v559_v29 }
  0x44   :  { %525 = vmatprep.subr.bf16.mxu1 %v682_v0 }
  0x46   :  { %506 = vmatpush3.bf16.msra.mxu0 %v552_v4 }
  0x47   :  { %507 = vmatprep.subr.bf16.mxu0 %v682_v0  ;;  %526 = vmatpush3.bf16.msra.mxu1 %v560_v30 }
  0x48   :  { %527 = vmatprep.subr.bf16.mxu1 %v682_v0 }
  0x4a   :  { %508 = vmatpush3.bf16.msra.mxu0 %v553_v5 }
  0x4b   :  { %509 = vmatprep.subr.bf16.mxu0 %v682_v0  ;;  %528 = vmatpush3.bf16.msra.mxu1 %v561_v31 }
  0x4c   :  { %529 = vmatprep.subr.bf16.mxu1 %v682_v0 }
  0x4e   :  { %510 = vmatpush3.bf16.msra.mxu0 %v554_v6 }
  0x4f   :  { %511 = vmatprep.subr.bf16.mxu0 %v682_v0  ;;  %530 = vmatpush3.bf16.msra.mxu1 %v562_v32 }
  0x50   :  { %531 = vmatprep.subr.bf16.mxu1 %v682_v0 }
  0x52   :  { %512 = vmatpush3.bf16.msra.mxu0 %v555_v7 }
  0x53   :  { %513 = vmatprep.subr.bf16.mxu0 %v682_v0  ;;  %532 = vmatpush3.bf16.msra.mxu1 %v563_v33 }
  0x54   :  { %533 = vmatprep.subr.bf16.mxu1 %v682_v0 }
  0x56   :  { %514 = vmatpush3.bf16.msra.mxu0 %v556_v8 }
  0x57   :  { %534 = vmatpush3.bf16.msra.mxu1 %v564_v34 }
  0x59   :  { %516 = vmatmul.mubr.bf16.vlgmr.msra.gmra.mrb[0].mxu0 %v77_v11 }
 0x12c   :  { %v183_v13 = vpop.f32.mrb[0].mxu0 }
 0x12d   :  { %v184_v14 = vadd.f32 %v459_v12, %v183_v13  ;;  %v517_v15 = vpop.f32.mrb[1].mxu0 }
 0x12e   :  { %v186_v16 = vpop.f32.mrb[2].mxu0 }
 0x12f   :  { %190 = vadd.xlane.f32.xlu0 %v184_v14  ;;  %v518_v17 = vpop.f32.mrb[3].mxu0  ;;  %v187_v18 = vadd.f32 %v459_v12, %v186_v16 }
 0x133   :  { %192 = vadd.xlane.f32.xlu0 %v187_v18 }
 0x1bc   :  { %v191_v19 = vpop.xlane.xlu0 %190 }
 0x1bd   :  { %v194_v20 = vmul.f32 0.0078125, %v191_v19 }
 0x1bf   :  { %v196_v21 = vsub.f32 %v184_v14, %v194_v20 }
 0x1c0   :  { %v193_v22 = vpop.xlane.xlu0 %192 }
 0x1c1   :  { %v195_v23 = vmul.f32 0.0078125, %v193_v22  ;;  %v198_v24 = vmul.f32 %v196_v21, %v196_v21 }
 0x1c3   :  { %v197_v25 = vsub.f32 %v187_v18, %v195_v23  ;;  %200 = vadd.xlane.f32.xlu1 %v198_v24 }
 0x1c5   :  { %v199_v26 = vmul.f32 %v197_v25, %v197_v25 }
 0x1c7   :  { %202 = vadd.xlane.f32.xlu1 %v199_v26 }
 0x250   :  { %v201_v35 = vpop.xlane.xlu1 %200 }
 0x251   :  { %v204_v36 = vmul.f32 0.0078125, %v201_v35 }
 0x253   :  { %v206_v37 = vadd.f32 1e-05, %v204_v36 }
 0x254   :  { %v203_v38 = vpop.xlane.xlu1 %202 }
 0x255   :  { %565 = vrsqrt.f32 %v206_v37  ;;  %v205_v39 = vmul.f32 0.0078125, %v203_v38 }
 0x257   :  { %v207_v40 = vadd.f32 1e-05, %v205_v39 }
 0x259   :  { %567 = vrsqrt.f32 %v207_v40  ;;  %v470_v40 = vld [vmem:[%s845_s6] ss:$0 sm:$0xff] }
 0x25f   :  { %v566_v41 = vpop.eup %565 }
 0x260   :  { %v210_v43 = vmul.f32 %v566_v41, %v196_v21 }
 0x262   :  { %v219_v45 = vmul.f32 %v468_v42, %v210_v43 }
 0x263   :  { %v568_v46 = vpop.eup %567 }
 0x264   :  { %v211_v47 = vmul.f32 %v568_v46, %v197_v25  ;;  %v228_v48 = vadd.f32 %v469_v44, %v219_v45 }
 0x266   :  { %v220_v49 = vmul.f32 %v468_v42, %v211_v47  ;;  %v232_v50 = vmul.f32 0.70710677, %v228_v48  ;;  %v230_v34 = vmul.f32 0.5, %v228_v48 }
 0x268   :  { %v229_v51 = vadd.f32 %v469_v44, %v220_v49  ;;  %v234_v52 = vand.u32 2147483647, %v232_v50  ;;  %vm274_vm1 = vcmp.lt.f32.partialorder %v232_v50, 0.0 }
 0x26a   :  { %v233_v53 = vmul.f32 0.70710677, %v229_v51  ;;  %v236_v54 = vmul.f32 0.3275911, %v234_v52  ;;  %v262_v59 = vsub.f32 0.0, %v234_v52  ;;  %v231_v35 = vmul.f32 0.5, %v229_v51 }
 0x26c   :  { %v235_v55 = vand.u32 2147483647, %v233_v53  ;;  %v238_v56 = vadd.f32 1.0, %v236_v54  ;;  %v264_v62 = vmul.f32 %v262_v59, %v234_v52  ;;  %vm275_vm2 = vcmp.lt.f32.partialorder %v233_v53, 0.0 }
 0x26e   :  { %v237_v57 = vmul.f32 0.3275911, %v235_v55  ;;  %569 = vrcp.f32 %v238_v56  ;;  %v263_v61 = vsub.f32 0.0, %v235_v55  ;;  %v266_v3 = vmul.f32 1.442695, %v264_v62 }
 0x26f   :  { %v479_v62 = vld [vmem:[%s846_s7] ss:$0 sm:$0xff]  ;;  %s647_s7 = scalar_lea.vmem %s447_s14, 256 }
 0x270   :  { %v239_v58 = vadd.f32 1.0, %v237_v57  ;;  %v265_v2 = vmul.f32 %v263_v61, %v235_v55  ;;  %p648_p10 = scmp.ne.s32.totalorder %s447_s14, %s647_s7  ;;  %p653_p12 = scmp.lt.s32.totalorder %s647_s7, %s647_s7 }
 0x272   :  { %571 = vrcp.f32 %v239_v58  ;;  %v268_v8 = vmul.f32 1.442695, %v265_v2  ;;  %p654_p13 = por %p653_p12, %p652_p11 }
 0x273   :  { %573 = vpow2.f32 %v266_v3 }
 0x274   :  { %575 = vpow2.f32 %v268_v8  ;;  %p655_p0 = pnand %p654_p13, %p648_p10 }
 0x278   :  { %v570_v60 = vpop.eup %569 }
 0x279   :  { %v244_v63 = vmul.f32 1.0614054, %v570_v60 }
 0x27b   :  { %v246_v0 = vadd.f32 -1.4531521, %v244_v63 }
 0x27c   :  { %v572_v1 = vpop.eup %571 }
 0x27d   :  { %v245_v4 = vmul.f32 1.0614054, %v572_v1  ;;  %v248_v5 = vmul.f32 %v570_v60, %v246_v0  ;;  %v574_v21 = vpop.eup %573 }
 0x27e   :  { %v576_v26 = vpop.eup %575 }
 0x27f   :  { %v247_v6 = vadd.f32 -1.4531521, %v245_v4  ;;  %v250_v7 = vadd.f32 1.4214138, %v248_v5 }
 0x281   :  { %v249_v11 = vmul.f32 %v572_v1, %v247_v6  ;;  %v252_v12 = vmul.f32 %v570_v60, %v250_v7 }
 0x283   :  { %v251_v13 = vadd.f32 1.4214138, %v249_v11  ;;  %v254_v14 = vadd.f32 -0.28449672, %v252_v12 }
 0x285   :  { %v253_v15 = vmul.f32 %v572_v1, %v251_v13  ;;  %v256_v16 = vmul.f32 %v570_v60, %v254_v14 }
 0x287   :  { %v255_v17 = vadd.f32 -0.28449672, %v253_v15  ;;  %v258_v18 = vadd.f32 0.2548296, %v256_v16 }
 0x289   :  { %v257_v19 = vmul.f32 %v572_v1, %v255_v17  ;;  %v260_v20 = vmul.f32 %v570_v60, %v258_v18 }
 0x28b   :  { %v259_v22 = vadd.f32 0.2548296, %v257_v19  ;;  %v270_v23 = vmul.f32 %v574_v21, %v260_v20 }
 0x28d   :  { %v261_v24 = vmul.f32 %v572_v1, %v259_v22  ;;  %v272_v25 = vsub.f32 1.0, %v270_v23  ;;  %v480_v1 = vld [vmem:[%s847_s8] ss:$0 sm:$0xff] }
 0x28f   :  { %v271_v27 = vmul.f32 %v576_v26, %v261_v24  ;;  %v276_v28 = vsub.f32 0.0, %v272_v25 }
 0x291   :  { %v273_v29 = vsub.f32 1.0, %v271_v27  ;;  %v278_v30 = vsel %vm274_vm1, %v276_v28, %v272_v25 }
 0x292   :  { %v280_v32 = vadd.f32 1.0, %v278_v30 }
 0x293   :  { %v277_v31 = vsub.f32 0.0, %v273_v29 }
 0x294   :  { %v282_v37 = vmul.f32 %v280_v32, %v230_v34 }
 0x295   :  { %v279_v33 = vsel %vm275_vm2, %v277_v31, %v273_v29 }
 0x296   :  { %v281_v36 = vadd.f32 1.0, %v279_v33 }
 0x298   :  { %v283_v38 = vmul.f32 %v281_v36, %v231_v35 }
 0x29a   :  { %v284_v39 = vpack.c.bf16 %v283_v38, %v282_v37 }
 0x29c   :  { %536 = vmatmul.mubr.bf16.vlgmr.msra.gmra.mrb[0].mxu1 %v284_v39 }
 0x36f   :  { %v390_v41 = vpop.f32.mrb[0].mxu1 }
 0x370   :  { %v391_v42 = vadd.f32 %v470_v40, %v390_v41  ;;  %v537_v43 = vpop.f32.mrb[1].mxu1 }
 0x371   :  { %v393_v44 = vpop.f32.mrb[2].mxu1 }
 0x372   :  { %v394_v45 = vadd.f32 %v470_v40, %v393_v44  ;;  %397 = vadd.xlane.f32.xlu0 %v391_v42  ;;  %v538_v46 = vpop.f32.mrb[3].mxu1 }
 0x374   :  { %399 = vadd.xlane.f32.xlu1 %v394_v45 }
 0x3ff   :  { %v398_v47 = vpop.xlane.xlu0 %397 }
 0x400   :  { %v401_v48 = vmul.f32 0.0078125, %v398_v47 }
 0x401   :  { %v400_v49 = vpop.xlane.xlu1 %399 }
 0x402   :  { %v403_v50 = vsub.f32 %v391_v42, %v401_v48  ;;  %v402_v51 = vmul.f32 0.0078125, %v400_v49 }
 0x404   :  { %v404_v52 = vsub.f32 %v394_v45, %v402_v51  ;;  %v405_v53 = vmul.f32 %v403_v50, %v403_v50 }
 0x406   :  { %407 = vadd.xlane.f32.xlu0 %v405_v53  ;;  %v406_v54 = vmul.f32 %v404_v52, %v404_v52 }
 0x408   :  { %409 = vadd.xlane.f32.xlu1 %v406_v54 }
 0x493   :  { %v408_v55 = vpop.xlane.xlu0 %407 }
 0x494   :  { %v411_v56 = vmul.f32 0.0078125, %v408_v55 }
 0x495   :  { %v410_v57 = vpop.xlane.xlu1 %409 }
 0x496   :  { %v413_v58 = vadd.f32 1e-05, %v411_v56  ;;  %v412_v59 = vmul.f32 0.0078125, %v410_v57 }
 0x498   :  { %577 = vrsqrt.f32 %v413_v58  ;;  %v414_v60 = vadd.f32 1e-05, %v412_v59 }
 0x49a   :  { %579 = vrsqrt.f32 %v414_v60 }
 0x4a2   :  { %v578_v61 = vpop.eup %577 }
 0x4a3   :  { %v417_v63 = vmul.f32 %v578_v61, %v403_v50 }
 0x4a4   :  { %v580_v0 = vpop.eup %579 }
 0x4a5   :  { %v418_v2 = vmul.f32 %v580_v0, %v404_v52  ;;  %v426_v3 = vmul.f32 %v479_v62, %v417_v63 }
 0x4a7   :  { %v427_v4 = vmul.f32 %v479_v62, %v418_v2  ;;  %v435_v5 = vadd.f32 %v480_v1, %v426_v3 }
 0x4a9   :  { %v436_v6 = vadd.f32 %v480_v1, %v427_v4  ;;  %v437_v7 = vadd.f32 %v435_v5, %v790_v9 }
 0x4ab   :  { %v438_v8 = vadd.f32 %v436_v6, %v792_v10  ;;  %439 = vst [vmem:[#allocation8] sm:$0xff] %v437_v7 }
 0x4ad   :  { %440 = vst [vmem:[#allocation8 + $0x8] sm:$0xff] %v438_v8 }
 0x4ae   :  { %658 = shalt.err (!%p655_p0)
}
 0x4af   :  { %s659_s16 = scalar_lea.hbm %s848_s9, 256 }
 0x4b0   :  { %p660_p1 = scmp.ne.s32.totalorder %s848_s9, %s659_s16  ;;  %p663_p2 = scmp.lt.u32.totalorder %s659_s16, %s848_s9 }
 0x4b2   :  { %p665_p3 = pnand %p663_p2, %p660_p1 }
 0x4b4   :  { %668 = shalt.err (!%p665_p3)
}
 0x4b5   :  { %452 = dma.vmem_to_hbm [thread:$0]  %s447_s14, 256, %s848_s9, [#allocation4], %s679_s1, %s679_s1, %s680_s10  }
 0x4b6   :  { %673 = dma.done.wait [#allocation4], 256  }
 0x4b7   :  { %674 = vsyncadd [#allocation4], 4294967040 }
 0x4b8   :  { %456 = vsyncpa [#allocation3], 1 }
 0x4b9   :  { %457 = vsyncpa [#allocation6], 1 }
 0x4ba   :  { %458 = vsyncpa [#allocation4], 1 }

</bundles_post_ra>
